<compile_context>
chip_gen: v7x
topology: tpu7x:2x2x1
jax: 0.10.0
libtpu: 0.0.40
codegen_flags: <defaults>
</compile_context>

<pallas_src>
import jax
import jax.numpy as jnp
from jax.experimental import pallas as pl
from jax.experimental.pallas import tpu as pltpu


def simple_net_kernel(x_ref, w1_ref, b1_ref, w2_ref, b2_ref, w3_ref, b3_ref,
                      o_ref):
    x = x_ref[...]                                     # f32 (tile_b, in_f)
    # Masks computed on the original x (mutually exclusive conditions), fused
    # into a single nested select; all in f32 (VPU-safe on v5e/v6e/v7x).
    xm = jnp.where(x == 0.0, jnp.float32(0.01),
                   jnp.where(jnp.isnan(x), jnp.float32(20.0), x))

    h1 = jnp.dot(xm, w1_ref[...], preferred_element_type=jnp.float32)
    h1 = jnp.maximum(h1 + b1_ref[...], 0.0)
    h2 = jnp.dot(h1, w2_ref[...], preferred_element_type=jnp.float32)
    h2 = jnp.maximum(h2 + b2_ref[...], 0.0)
    o_ref[...] = (jnp.dot(h2, w3_ref[...], preferred_element_type=jnp.float32)
                  + b3_ref[...])


def _round_up(n, m):
    return ((n + m - 1) // m) * m


def simple_net_forward(x, w1, b1, w2, b2, w3, b3, *, max_tile_b=1024):
    """x: (B, in_f) f32; w_i: (in_i, out_i) f32; b_i: (1, out_i) f32."""
    B, in_f = x.shape
    out_f = w3.shape[1]

    # Batch tile: multiple of 8 sublanes, capped so there are always >= 2 grid
    # steps (v7x megacore sharding of the "parallel" batch axis).
    tile_b = min(max_tile_b, max(8, _round_up(pl.cdiv(B, 2), 8)))
    num_tiles = pl.cdiv(max(B, 1), tile_b)
    if num_tiles < 2:
        num_tiles = 2
    if num_tiles % 2:
        num_tiles += 1                      # even grid: both v7x TCs stay busy
    Bp = num_tiles * tile_b
    if Bp != B:
        x = jnp.pad(x, ((0, Bp - B), (0, 0)))

    grid = (num_tiles,)
    # Weights/biases: constant index_map -> VMEM-resident across batch tiles.
    const = lambda shape: pl.BlockSpec(shape, lambda i: (0, 0))

    out = pl.pallas_call(
        simple_net_kernel,
        out_shape=jax.ShapeDtypeStruct((Bp, out_f), jnp.float32),
        grid=grid,
        in_specs=[
            pl.BlockSpec((tile_b, in_f), lambda i: (i, 0)),
            const(w1.shape), const(b1.shape),
            const(w2.shape), const(b2.shape),
            const(w3.shape), const(b3.shape),
        ],
        out_specs=pl.BlockSpec((tile_b, out_f), lambda i: (i, 0)),
        compiler_params=pltpu.CompilerParams(
            dimension_semantics=("parallel",)),
    )(x, w1, b1, w2, b2, w3, b3)

    # Un-pad the batch and match PyTorch's final .squeeze().
    return jnp.squeeze(out[:B])


def xavier_uniform(key, fan_in, fan_out):
    # torch.nn.init.xavier_uniform_ on a (out, in) weight; built pre-transposed
    # to (in, out) for the kernel's row-major matmuls.
    limit = jnp.sqrt(6.0 / (fan_in + fan_out))
    return jax.random.uniform(key, (fan_in, fan_out), jnp.float32, -limit, limit)


if __name__ == "__main__":
    # Small shapes consistent with the module: input=32, hidden=[64, 32], output=4
    input_sizes = 32
    hidden_layer_sizes = [64, 32]
    output_size = 4
    batch = 2

    key = jax.random.PRNGKey(0)
    kx, k1, k2, k3 = jax.random.split(key, 4)

    # Deterministic parameters (Xavier-uniform weights, constant-per-layer biases).
    w1 = xavier_uniform(k1, input_sizes, hidden_layer_sizes[0])
    b1 = jnp.full((1, hidden_layer_sizes[0]), 0.05, jnp.float32)
    w2 = xavier_uniform(k2, hidden_layer_sizes[0], hidden_layer_sizes[1])
    b2 = jnp.full((1, hidden_layer_sizes[1]), 0.10, jnp.float32)
    w3 = xavier_uniform(k3, hidden_layer_sizes[1], output_size)
    b3 = jnp.full((1, output_size), 0.15, jnp.float32)

    # Input with some NaNs and exact zeros to exercise the masking path.
    x = jax.random.normal(kx, (batch, input_sizes), jnp.float32)
    x = x.at[0, 3].set(jnp.nan)
    x = x.at[1, 7].set(0.0)
    x = x.at[0, 0].set(0.0)

    out = simple_net_forward(x, w1, b1, w2, b2, w3, b3)
    out = jax.block_until_ready(out)

    # Pure-JAX f32 reference mirroring the PyTorch forward.
    xm = jnp.where(x == 0.0, 0.01, jnp.where(jnp.isnan(x), 20.0, x))
    h = jnp.maximum(xm @ w1 + b1, 0.0)
    h = jnp.maximum(h @ w2 + b2, 0.0)
    ref = jnp.squeeze(h @ w3 + b3)

    assert out.shape == ref.shape, (out.shape, ref.shape)
    assert bool(jnp.all(jnp.isfinite(out))), out
    assert jnp.allclose(out, ref, atol=1e-4, rtol=1e-4), (out, ref)

    print("KERNEL_OK")
</pallas_src>

<mosaic_0001>
module attributes {stable_mosaic.version = 11 : i64} {
  func.func @simple_net_kernel(%arg0: i32, %arg1: memref<8x32xf32, #tpu.memory_space<vmem>>, %arg2: memref<32x64xf32, #tpu.memory_space<vmem>>, %arg3: memref<1x64xf32, #tpu.memory_space<vmem>>, %arg4: memref<64x32xf32, #tpu.memory_space<vmem>>, %arg5: memref<1x32xf32, #tpu.memory_space<vmem>>, %arg6: memref<32x4xf32, #tpu.memory_space<vmem>>, %arg7: memref<1x4xf32, #tpu.memory_space<vmem>>, %arg8: memref<8x4xf32, #tpu.memory_space<vmem>>) attributes {dimension_semantics = [#tpu.dimension_semantics<parallel>], iteration_bounds = array<i64: 2>, scalar_prefetch = 0 : i64, scratch_operands = 0 : i64, tpu.core_type = #tpu.core_type<tc>, window_params = [{transform_indices = @transform_0, window_bounds = array<i64: 8, 32>}, {pipeline_mode = #tpu.pipeline_mode<synchronous>, transform_indices = @transform_1, window_bounds = array<i64: 32, 64>}, {pipeline_mode = #tpu.pipeline_mode<synchronous>, transform_indices = @transform_2, window_bounds = array<i64: 1, 64>}, {pipeline_mode = #tpu.pipeline_mode<synchronous>, transform_indices = @transform_3, window_bounds = array<i64: 64, 32>}, {pipeline_mode = #tpu.pipeline_mode<synchronous>, transform_indices = @transform_4, window_bounds = array<i64: 1, 32>}, {pipeline_mode = #tpu.pipeline_mode<synchronous>, transform_indices = @transform_5, window_bounds = array<i64: 32, 4>}, {pipeline_mode = #tpu.pipeline_mode<synchronous>, transform_indices = @transform_6, window_bounds = array<i64: 1, 4>}, {transform_indices = @transform_7, window_bounds = array<i64: 8, 4>}]} {
    %c0 = arith.constant 0 : index
    %c0_0 = arith.constant 0 : index
    %0 = vector.load %arg1[%c0, %c0_0] : memref<8x32xf32, #tpu.memory_space<vmem>>, vector<8x32xf32>
    %cst = arith.constant 0.000000e+00 : f32
    %1 = vector.broadcast %cst : f32 to vector<8x32xf32>
    %2 = arith.cmpf oeq, %0, %1 : vector<8x32xf32>
    %3 = arith.cmpf one, %0, %0 : vector<8x32xf32>
    %cst_1 = arith.constant 2.000000e+01 : f32
    %4 = vector.broadcast %cst_1 : f32 to vector<8x32xf32>
    %5 = arith.select %3, %4, %0 : vector<8x32xi1>, vector<8x32xf32>
    %cst_2 = arith.constant 0.00999999977 : f32
    %6 = vector.broadcast %cst_2 : f32 to vector<8x32xf32>
    %7 = arith.select %2, %6, %5 : vector<8x32xi1>, vector<8x32xf32>
    %c0_3 = arith.constant 0 : index
    %c0_4 = arith.constant 0 : index
    %8 = vector.load %arg2[%c0_3, %c0_4] : memref<32x64xf32, #tpu.memory_space<vmem>>, vector<32x64xf32>
    %cst_5 = arith.constant dense<0.000000e+00> : vector<8x64xf32>
    %9 = tpu.matmul %7, %8, %cst_5 {dimension_numbers = #tpu.dot_dimension_numbers<[1], [0], [0], [1], [0, 0, 1, 1], [], []>} : vector<8x32xf32>, vector<32x64xf32>, vector<8x64xf32> -> vector<8x64xf32>
    %c0_6 = arith.constant 0 : index
    %c0_7 = arith.constant 0 : index
    %10 = vector.load %arg3[%c0_6, %c0_7] : memref<1x64xf32, #tpu.memory_space<vmem>>, vector<1x64xf32>
    %11 = vector.broadcast %10 : vector<1x64xf32> to vector<8x64xf32>
    %12 = arith.addf %9, %11 : vector<8x64xf32>
    %cst_8 = arith.constant 0.000000e+00 : f32
    %13 = vector.broadcast %cst_8 : f32 to vector<8x64xf32>
    %14 = arith.maximumf %12, %13 : vector<8x64xf32>
    %c0_9 = arith.constant 0 : index
    %c0_10 = arith.constant 0 : index
    %15 = vector.load %arg4[%c0_9, %c0_10] : memref<64x32xf32, #tpu.memory_space<vmem>>, vector<64x32xf32>
    %cst_11 = arith.constant dense<0.000000e+00> : vector<8x32xf32>
    %16 = tpu.matmul %14, %15, %cst_11 {dimension_numbers = #tpu.dot_dimension_numbers<[1], [0], [0], [1], [0, 0, 1, 1], [], []>} : vector<8x64xf32>, vector<64x32xf32>, vector<8x32xf32> -> vector<8x32xf32>
    %c0_12 = arith.constant 0 : index
    %c0_13 = arith.constant 0 : index
    %17 = vector.load %arg5[%c0_12, %c0_13] : memref<1x32xf32, #tpu.memory_space<vmem>>, vector<1x32xf32>
    %18 = vector.broadcast %17 : vector<1x32xf32> to vector<8x32xf32>
    %19 = arith.addf %16, %18 : vector<8x32xf32>
    %cst_14 = arith.constant 0.000000e+00 : f32
    %20 = vector.broadcast %cst_14 : f32 to vector<8x32xf32>
    %21 = arith.maximumf %19, %20 : vector<8x32xf32>
    %c0_15 = arith.constant 0 : index
    %c0_16 = arith.constant 0 : index
    %22 = vector.load %arg6[%c0_15, %c0_16] : memref<32x4xf32, #tpu.memory_space<vmem>>, vector<32x4xf32>
    %cst_17 = arith.constant dense<0.000000e+00> : vector<8x4xf32>
    %23 = tpu.matmul %21, %22, %cst_17 {dimension_numbers = #tpu.dot_dimension_numbers<[1], [0], [0], [1], [0, 0, 1, 1], [], []>} : vector<8x32xf32>, vector<32x4xf32>, vector<8x4xf32> -> vector<8x4xf32>
    %c0_18 = arith.constant 0 : index
    %c0_19 = arith.constant 0 : index
    %24 = vector.load %arg7[%c0_18, %c0_19] : memref<1x4xf32, #tpu.memory_space<vmem>>, vector<1x4xf32>
    %25 = vector.broadcast %24 : vector<1x4xf32> to vector<8x4xf32>
    %26 = arith.addf %23, %25 : vector<8x4xf32>
    %c0_20 = arith.constant 0 : index
    %c0_21 = arith.constant 0 : index
    %27 = vector.load %arg8[%c0_20, %c0_21] : memref<8x4xf32, #tpu.memory_space<vmem>>, vector<8x4xf32>
    tpu.vector_store %arg8[%c0_20, %c0_21], %26 {strides = array<i32>} : memref<8x4xf32, #tpu.memory_space<vmem>>, vector<8x4xf32>,
    return
  }
  func.func @transform_0(%arg0: i32) -> (i32, i32) {
    %c0_i32 = arith.constant 0 : i32
    %c0_i32_0 = arith.constant 0 : i32
    return %arg0, %c0_i32 : i32, i32
  }
  func.func @transform_1(%arg0: i32) -> (i32, i32) {
    %c0_i32 = arith.constant 0 : i32
    %c0_i32_0 = arith.constant 0 : i32
    %c0_i32_1 = arith.constant 0 : i32
    return %c0_i32, %c0_i32_0 : i32, i32
  }
  func.func @transform_2(%arg0: i32) -> (i32, i32) {
    %c0_i32 = arith.constant 0 : i32
    %c0_i32_0 = arith.constant 0 : i32
    %c0_i32_1 = arith.constant 0 : i32
    return %c0_i32, %c0_i32_0 : i32, i32
  }
  func.func @transform_3(%arg0: i32) -> (i32, i32) {
    %c0_i32 = arith.constant 0 : i32
    %c0_i32_0 = arith.constant 0 : i32
    %c0_i32_1 = arith.constant 0 : i32
    return %c0_i32, %c0_i32_0 : i32, i32
  }
  func.func @transform_4(%arg0: i32) -> (i32, i32) {
    %c0_i32 = arith.constant 0 : i32
    %c0_i32_0 = arith.constant 0 : i32
    %c0_i32_1 = arith.constant 0 : i32
    return %c0_i32, %c0_i32_0 : i32, i32
  }
  func.func @transform_5(%arg0: i32) -> (i32, i32) {
    %c0_i32 = arith.constant 0 : i32
    %c0_i32_0 = arith.constant 0 : i32
    %c0_i32_1 = arith.constant 0 : i32
    return %c0_i32, %c0_i32_0 : i32, i32
  }
  func.func @transform_6(%arg0: i32) -> (i32, i32) {
    %c0_i32 = arith.constant 0 : i32
    %c0_i32_0 = arith.constant 0 : i32
    %c0_i32_1 = arith.constant 0 : i32
    return %c0_i32, %c0_i32_0 : i32, i32
  }
  func.func @transform_7(%arg0: i32) -> (i32, i32) {
    %c0_i32 = arith.constant 0 : i32
    %c0_i32_0 = arith.constant 0 : i32
    return %arg0, %c0_i32 : i32, i32
  }
}

</mosaic_0001>

<bundles_post_ra>
// kernel: tpu_custom_call.1
= control target key start
LH: loop header
LB: loop body
LE: loop exit
PB: predicated region body
PF: predicated region fallthrough
CT: control target
= control target key end

     0   :  { %s755_s24 = smov 0   ;;  %s841_s0 = inlined_call_operand.vmem [shape: f32[16,32], index: 0, kind: input, shape index: {}]   ;;  %s842_s1 = inlined_call_operand.vmem [shape: f32[32,64], index: 1, kind: input, shape index: {}]   ;;  %s843_s2 = inlined_call_operand.vmem [shape: f32[1,64], index: 2, kind: input, shape index: {}]   ;;  %s844_s3 = inlined_call_operand.vmem [shape: f32[64,32], index: 3, kind: input, shape index: {}]   ;;  %s845_s4 = inlined_call_operand.vmem [shape: f32[1,32], index: 4, kind: input, shape index: {}]   ;;  %s846_s5 = inlined_call_operand.vmem [shape: f32[32,4], index: 5, kind: input, shape index: {}]   ;;  %s847_s6 = inlined_call_operand.vmem [shape: f32[1,4], index: 6, kind: input, shape index: {}]   ;;  %s848_s7 = inlined_call_operand.vmem [shape: f32[16,4], index: 7, kind: output, shape index: {}]  }
   0x1 LB: > { %s594_s25 = sadd.s32 4294967295, %s710_s24   ;;  %p598_p0 = scmp.ge.s32.totalorder %s710_s24, 1  ;;  %s710_s24 = sphi %s755_s24, %s17_s24  }
   0x2   : > { %p236_p1 = scmp.lt.s32.totalorder %s710_s24, 3 }
   0x4   : > { %p237_p2 = pnand %p598_p0, %p236_p1 }
   0x5   : > { %v279_v0 = vld [vmem:[%s842_s1] sm:$0xff] (!%p237_p2)  ;;  %v280_v1 = vld [vmem:[%s842_s1 + $0x8] sm:$0xff] (!%p237_p2)  ;;  %v281_v2 = vld [vmem:[%s842_s1 + $0x10] sm:$0xff] (!%p237_p2)  ;;  %v712_v3 = vmov (!%p237_p2), 0.0|0.0   ;;  %vm713_vm0 = vmmov (!%p237_p2), 0   ;;  %v714_v6 = vmov (!%p237_p2), 0.0  }
   0x6   : > { %240 = sbr.rel (%p237_p2) target bundleno = 667 (0x29b), region = 48  ;;  %669 = vmatprep.subr.bf16.mxu0 (!%p237_p2), %v712_v3  ;;  %v670_v4 = vpack.c.bf16 (!%p237_p2), %v280_v1, %v279_v0  ;;  %v282_v5 = vld [vmem:[%s842_s1 + $0x18] sm:$0xff] (!%p237_p2)  ;;  %636 = vmatprep.mubr.msk.f32.mxu0 (!%p237_p2), %vm713_vm0, %v714_v6  ;;  %p266_p3 = scmp.lt.s32.totalorder (!%p237_p2), %s594_s25, 1  ;;  %v365_v7 = vld [vmem:[%s844_s3] sm:$0xff] (!%p237_p2)  ;;  %v366_v8 = vld [vmem:[%s844_s3 + $0x8] sm:$0xff] (!%p237_p2)  ;;  %vm290_vm3 = vcmask (!%p237_p2), 261120  }
   0x7   : > { %675 = vmatprep.subr.bf16.mxu1 (!%p237_p2), %v712_v3  ;;  %v676_v9 = vpack.c.bf16 (!%p237_p2), %v366_v8, %v365_v7  ;;  %v367_v10 = vld [vmem:[%s844_s3 + $0x10] sm:$0xff] (!%p237_p2)  ;;  %v368_v11 = vld [vmem:[%s844_s3 + $0x18] sm:$0xff] (!%p237_p2)  ;;  %655 = vmatprep.mubr.msk.f32.mxu1 (!%p237_p2), %vm713_vm0, %v714_v6  ;;  %v673_v12 = vpack.c.bf16 (!%p237_p2), %v282_v5, %v281_v2  ;;  %v369_v14 = vld [vmem:[%s844_s3 + $0x20] sm:$0xff] (!%p237_p2)  ;;  %vm380_vm4 = vcmask (!%p237_p2), 523264   ;;  %vm539_vm5 = vcmask (!%p237_p2), 31744  }
   0x8   : > { %671 = vmatpush3.bf16.msra.mxu0 (!%p237_p2), %v670_v4  ;;  %v679_v13 = vpack.c.bf16 (!%p237_p2), %v368_v11, %v367_v10  ;;  %v370_v15 = vld [vmem:[%s844_s3 + $0x28] sm:$0xff] (!%p237_p2)  ;;  %v371_v20 = vld [vmem:[%s844_s3 + $0x30] sm:$0xff] (!%p237_p2)  ;;  %v372_v21 = vld [vmem:[%s844_s3 + $0x38] sm:$0xff] (!%p237_p2) }
   0x9   : > { %672 = vmatprep.subr.bf16.mxu0 (!%p237_p2), %v712_v3  ;;  %677 = vmatpush3.bf16.msra.mxu1 (!%p237_p2), %v676_v9  ;;  %v682_v17 = vpack.c.bf16 (!%p237_p2), %v370_v15, %v369_v14  ;;  %v685_v22 = vpack.c.bf16 (!%p237_p2), %v372_v21, %v371_v20  ;;  %v455_v23 = vld [vmem:[%s846_s5] sm:$0xff] (!%p237_p2)  ;;  %v456_v24 = vld [vmem:[%s846_s5 + $0x8] sm:$0xff] (!%p237_p2)  ;;  %v457_v31 = vld [vmem:[%s846_s5 + $0x10] sm:$0xff] (!%p237_p2) }
   0xa   : > { %678 = vmatprep.subr.bf16.mxu1 (!%p237_p2), %v712_v3  ;;  %v688_v25 = vpack.c.bf16 (!%p237_p2), %v456_v24, %v455_v23  ;;  %v601_v26 = vld [vmem:[%s843_s2] ss:$0 sm:$0xff] (!%p237_p2)  ;;  %v458_v32 = vld [vmem:[%s846_s5 + $0x18] sm:$0xff] (!%p237_p2) }
   0xb   : > { %v691_v33 = vpack.c.bf16 (!%p237_p2), %v458_v32, %v457_v31  ;;  %v603_v34 = vld [vmem:[%s845_s4] ss:$0 sm:$0xff] (!%p237_p2) }
   0xc   : > { %674 = vmatpush3.bf16.msra.mxu0 (!%p237_p2), %v673_v12  ;;  %v605_v39 = vld [vmem:[%s847_s6] ss:$0 sm:$0xff] (!%p237_p2) }
   0xd   : > { %s850_s25 = smov (!%p266_p3, %s594_s25), 1  ;;  %680 = vmatpush3.bf16.msra.mxu1 %v679_v13  ;;  %687 = vmatprep.subr.bf16.mxu0 %v712_v3 }
   0xe   : > { %s599_s19 = sshll.u32 %s850_s25, 3  ;;  %681 = vmatprep.subr.bf16.mxu1 %v712_v3 }
   0xf   : > { %s269_s28 = scalar_lea.vmem %s841_s0, %s599_s19  ;;  %s273_s29 = scalar_lea.vmem %s848_s7, %s599_s19 }
  0x10   : > { %v274_v16 = vld [vmem:[%s269_s28] sm:$0xff] }
  0x11   : > { %vm275_vm1 = vcmp.eq.f32.partialorder %v274_v16, 0.0  ;;  %vm276_vm2 = vcmp.ne.f32.partialorder %v274_v16, %v274_v16  ;;  %683 = vmatpush3.bf16.msra.mxu1 %v682_v17 }
  0x12   : > { %v277_v18 = vsel %vm276_vm2, 20.0, %v274_v16  ;;  %684 = vmatprep.subr.bf16.mxu1 %v712_v3 }
  0x13   : > { %v278_v19 = vsel %vm275_vm1, 0.01, %v277_v18 }
  0x14   : > { %637 = vmatmul.mubr.msk.f32.vlgmr.msra.gmra.mrb[0].mxu0 %vm290_vm3, %v278_v19 }
  0x15   : > { %666 = vmatprep.mubr.msk.f32.mxu0 %vm713_vm0, %v714_v6  ;;  %686 = vmatpush3.bf16.msra.mxu1 %v685_v22 }
  0x16   : > { %689 = vmatpush3.bf16.msra.mxu0 %v688_v25 }
  0x17   : > { %690 = vmatprep.subr.bf16.mxu0 %v712_v3 }
  0x1a   : > { %692 = vmatpush3.bf16.msra.mxu0 %v691_v33 }
  0xe7   : > { %v360_v27 = vpop.f32.mrb[0].mxu0 }
  0xe8   : > { %v361_v28 = vadd.f32 %v601_v26, %v360_v27  ;;  %v638_v29 = vpop.f32.mrb[1].mxu0 }
  0xea   : > { %v364_v30 = vmax.f32 %v361_v28, 0.0 }
  0xec   : > { %656 = vmatmul.mubr.msk.f32.vlgmr.msra.gmra.mrb[0].mxu1 %vm380_vm4, %v364_v30 }
 0x1bf   : > { %v450_v35 = vpop.f32.mrb[0].mxu1 }
 0x1c0   : > { %v451_v36 = vadd.f32 %v603_v34, %v450_v35  ;;  %v657_v37 = vpop.f32.mrb[1].mxu1 }
 0x1c2   : > { %v454_v38 = vmax.f32 %v451_v36, 0.0 }
 0x1c4   : > { %667 = vmatmul.mubr.msk.f32.vlgmr.msra.gmra.mrb[2].mxu0 %vm290_vm3, %v454_v38 }
 0x297   : > { %v535_v40 = vpop.f32.mrb[2].mxu0 }
 0x298   : > { %v536_v41 = vadd.f32 %v605_v39, %v535_v40  ;;  %v668_v42 = vpop.f32.mrb[3].mxu0 }
 0x29a   : > { %540 = vst.msk [vmem:[%s273_s29] sm:$0xff] %vm539_vm5, %v536_v41 }
 0x29b PF: > { %s17_s24 = sadd.s32 1, %s710_s24  }
 0x29c   : > { %p14_p4 = scmp.ge.s32.totalorder %s17_s24, 4  }
 0x29e   :  { %16 = sbr.rel (!%p14_p4) target bundleno = 1 (0x1), region = 78 }

</bundles_post_ra>
